<compile_context>
chip_gen: v7x
topology: tpu7x:2x2x1
jax: 0.10.0
libtpu: 0.0.40
codegen_flags: <defaults>
</compile_context>

<pallas_src>
import functools

import jax
import jax.numpy as jnp
from jax.experimental import pallas as pl
from jax.experimental.pallas import tpu as pltpu

LN_EPS = 1e-5  # PyTorch nn.LayerNorm default eps


def _round_up(v, m):
    return (v + m - 1) // m * m


def _cdiv(a, b):
    return -(-a // b)


def _tpu_vmem_and_cores():
    """Best-effort per-core VMEM capacity and TensorCores-per-device query."""
    vmem_cap = 64 * 1024 * 1024      # conservative fallback (v7x per-TC size)
    num_tc = 1
    try:
        vmem_cap = int(pltpu.get_tpu_info().vmem_capacity_bytes)
    except Exception:
        pass
    try:
        dev = jax.devices()[0]
        kind = str(getattr(dev, "device_kind", "")).lower()
        cores = getattr(dev, "num_cores", None)
        if isinstance(cores, int) and cores > 1:
            num_tc = cores
        elif any(tag in kind for tag in ("v4", "v5p", "v7", "7x")):
            num_tc = 2               # megacore / dual-TensorCore chips
    except Exception:
        pass
    return vmem_cap, num_tc


def _channel_mixing_kernel(x_ref, g_ref, b_ref, w1_ref, b1_ref, w2_ref, b2_ref,
                           o_ref, xn_sc, acc_sc, *, inv_c, gelu_approx):
    # Grid: (row_tiles, hidden_tiles).  x / out blocks are resident across the
    # hidden axis; acc_sc accumulates the fc2 partial products in f32.
    j = pl.program_id(1)

    @pl.when(j == 0)
    def _init():
        x = x_ref[...].astype(jnp.float32)
        # Two-pass LayerNorm statistics (more robust than E[x^2]-E[x]^2).
        mean = jnp.sum(x, axis=-1, keepdims=True) * inv_c
        xc = x - mean
        var = jnp.sum(xc * xc, axis=-1, keepdims=True) * inv_c
        xn = xc * jax.lax.rsqrt(var + LN_EPS)
        xn = xn * g_ref[...] + b_ref[...]
        xn_sc[...] = xn.astype(xn_sc.dtype)          # cached once, compute dtype
        acc_sc[...] = jnp.zeros_like(acc_sc)

    # fc1 chunk (C -> th) + GELU + fc2 chunk (th -> C), f32 accumulation.
    h = jnp.dot(xn_sc[...], w1_ref[...], preferred_element_type=jnp.float32)
    h = jax.nn.gelu(h + b1_ref[...], approximate=gelu_approx)
    # TODO(synk): training-mode dropout1/dropout2 would use pltpu.prng_*; eval -> identity.
    acc_sc[...] += jnp.dot(h.astype(w2_ref.dtype), w2_ref[...],
                           preferred_element_type=jnp.float32)

    @pl.when(j == pl.num_programs(1) - 1)
    def _finalize():
        y = acc_sc[...] + b2_ref[...] + x_ref[...].astype(jnp.float32)
        o_ref[...] = y.astype(o_ref.dtype)


@functools.partial(jax.jit, static_argnames=("tile_rows", "hidden_tile",
                                              "use_bf16", "gelu_approximate"))
def channel_mixing_mlp(x, gamma, beta, w1, b1, w2, b2, *,
                       tile_rows=512, hidden_tile=2048,
                       use_bf16=True, gelu_approximate=True):
    """x: [B, S, C]; gamma/beta: [C]; w1: [C, H]; b1: [H]; w2: [H, C]; b2: [C]."""
    B, S, C = x.shape
    H = w1.shape[1]
    rows = B * S

    # ---- generation-aware VMEM budget ----
    vmem_cap, num_tc = _tpu_vmem_and_cores()
    limit_cap = max(vmem_cap - (8 << 20), 40 << 20)          # Mosaic headroom
    budget = max(min(limit_cap - (4 << 20), vmem_cap * 3 // 4), 32 << 20)

    compute_dtype = jnp.bfloat16 if use_bf16 else jnp.dtype(w1.dtype)
    xb = jnp.dtype(x.dtype).itemsize
    cb = jnp.dtype(compute_dtype).itemsize

    # ---- initial tiles (row tile multiple of 128; hidden tile multiple of 128)
    H128 = _round_up(H, 128)
    th = min(_round_up(hidden_tile, 128), H128)
    tr = rows if rows <= max(tile_rows, 128) else _round_up(tile_rows, 128)

    def footprint(tr_, th_, wbuf_):
        io = 2 * 2 * tr_ * C * xb                    # x in + out, double-buffered
        weights = wbuf_ * (2 * C * th_ * cb + th_ * 4)   # w1 + w2 chunks + b1
        small = 3 * C * 4                            # gamma, beta, b2
        scratch = tr_ * C * (cb + 4)                 # xn cache + f32 accumulator
        h_tmp = 2 * tr_ * th_ * 4                    # fc1 / GELU intermediates
        return io + weights + small + scratch + h_tmp

    def wbuf_for(th_):
        return 1 if th_ >= H else 2

    # ---- shrink th (weight/h-dominated) and tr (activation-dominated) to fit
    while footprint(tr, th, wbuf_for(th)) > budget:
        fp = footprint(tr, th, wbuf_for(th))
        th_bytes = wbuf_for(th) * 2 * C * th * cb + 2 * tr * th * 4
        if th > 128 and (2 * th_bytes > fp or tr <= 256):
            th = max(128, _round_up(th // 2, 128))
        elif tr > 256:
            tr = max(128, _round_up(tr // 2, 128))
        elif tr > 128:
            tr = 128
        else:
            break

    num_r = _cdiv(rows, tr)
    # Only split a single row tile when the device actually has 2 TensorCores.
    if num_tc >= 2 and num_r == 1 and tr >= 256:
        tr = max(128, _round_up(tr // 2, 128))
        num_r = _cdiv(rows, tr)

    # ---- hidden-axis chunking (pad only the parameters, zeros are inert) ----
    if th >= H:
        th, Hp, num_h = H, H, 1
    else:
        Hp = _round_up(H, th)
        num_h = Hp // th

    if num_h == 1:
        w_buf = 1
    else:
        w_buf = 3 if (num_h > 2 and footprint(tr, th, 3) <= budget) else 2

    fp = footprint(tr, th, w_buf)
    vmem_limit = int(min(max(fp * 3 // 2 + (2 << 20), 32 << 20), limit_cap))

    # ---- prepare operands: NO padding / slicing of the activation ----
    x2d = x.reshape(rows, C)                         # row-major reshape, no copy
    g2 = gamma.astype(jnp.float32).reshape(1, C)
    be2 = beta.astype(jnp.float32).reshape(1, C)
    b2p = b2.astype(jnp.float32).reshape(1, C)
    w1p = w1.astype(compute_dtype)
    w2p = w2.astype(compute_dtype)
    b1p = b1.astype(jnp.float32)
    if Hp > H:
        w1p = jnp.pad(w1p, ((0, 0), (0, Hp - H)))
        b1p = jnp.pad(b1p, (0, Hp - H))
        w2p = jnp.pad(w2p, ((0, Hp - H), (0, 0)))
    b1p = b1p.reshape(1, Hp)

    def const_spec(shape):
        # Grid-invariant parameter block: single buffer.
        return pl.BlockSpec(shape, lambda i, j: (0, 0),
                            pipeline_mode=pl.Buffered(buffer_count=1))

    def w_spec(shape, index_map):
        if num_h == 1:
            return pl.BlockSpec(shape, index_map,
                                pipeline_mode=pl.Buffered(buffer_count=1))
        if w_buf != 2:
            return pl.BlockSpec(shape, index_map,
                                pipeline_mode=pl.Buffered(buffer_count=w_buf))
        return pl.BlockSpec(shape, index_map)

    row_spec = pl.BlockSpec((tr, C), lambda i, j: (i, 0))

    out2d = pl.pallas_call(
        functools.partial(_channel_mixing_kernel, inv_c=1.0 / C,
                          gelu_approx=gelu_approximate),
        out_shape=jax.ShapeDtypeStruct((rows, C), x.dtype),
        grid_spec=pltpu.PrefetchScalarGridSpec(
            num_scalar_prefetch=0,
            grid=(num_r, num_h),
            in_specs=[
                row_spec,                                   # x tile
                const_spec((1, C)),                         # gamma
                const_spec((1, C)),                         # beta
                w_spec((C, th), lambda i, j: (0, j)),       # w1 chunk
                w_spec((1, th), lambda i, j: (0, j)),       # b1 chunk
                w_spec((th, C), lambda i, j: (j, 0)),       # w2 chunk
                const_spec((1, C)),                         # b2
            ],
            out_specs=row_spec,
            scratch_shapes=[pltpu.VMEM((tr, C), compute_dtype),   # xn cache
                            pltpu.VMEM((tr, C), jnp.float32)],    # fc2 accumulator
        ),
        compiler_params=pltpu.CompilerParams(
            dimension_semantics=("parallel", "arbitrary"),
            vmem_limit_bytes=vmem_limit),
    )(x2d, g2, be2, w1p, b1p, w2p, b2p)

    return out2d.reshape(B, S, C)


def _reference(x, gamma, beta, w1, b1, w2, b2, *, use_bf16=True,
               gelu_approximate=True):
    """Pure-JAX reference mirroring the kernel's precision policy.

    With use_bf16=False and gelu_approximate=False this matches the PyTorch
    forward (eval mode, exact-erf nn.GELU) exactly.
    """
    cdt = jnp.bfloat16 if use_bf16 else w1.dtype
    xf = x.astype(jnp.float32)
    mean = jnp.mean(xf, axis=-1, keepdims=True)
    var = jnp.mean(jnp.square(xf - mean), axis=-1, keepdims=True)
    xn = (xf - mean) * jax.lax.rsqrt(var + LN_EPS)
    xn = xn * gamma.astype(jnp.float32) + beta.astype(jnp.float32)
    h = jnp.dot(xn.astype(cdt), w1.astype(cdt),
                preferred_element_type=jnp.float32) + b1.astype(jnp.float32)
    h = jax.nn.gelu(h, approximate=gelu_approximate)
    y = jnp.dot(h.astype(cdt), w2.astype(cdt),
                preferred_element_type=jnp.float32) + b2.astype(jnp.float32)
    return (y + xf).astype(x.dtype)


if __name__ == "__main__":
    # Small shapes consistent with the module: x = [batch, seq, channels],
    # in_dim = norm_dim = channels, hidden_dim = hidden.
    B, S, C, HID = 2, 8, 32, 64

    key = jax.random.PRNGKey(0)
    kx, kw1, kb1, kw2, kb2 = jax.random.split(key, 5)

    x = jax.random.normal(kx, (B, S, C), dtype=jnp.float32)

    gamma = jnp.ones((C,), jnp.float32)   # nn.LayerNorm default weight
    beta = jnp.zeros((C,), jnp.float32)   # nn.LayerNorm default bias
    w1 = jax.random.normal(kw1, (C, HID), dtype=jnp.float32) * 0.05
    b1 = jax.random.normal(kb1, (HID,), dtype=jnp.float32) * 0.05
    w2 = jax.random.normal(kw2, (HID, C), dtype=jnp.float32) * 0.05
    b2 = jax.random.normal(kb2, (C,), dtype=jnp.float32) * 0.05

    out = channel_mixing_mlp(x, gamma, beta, w1, b1, w2, b2)
    out = jax.block_until_ready(out)

    # Compare against a reference using the same precision policy
    # (bf16 weights into the MXU, tanh GELU) — isolates kernel correctness.
    ref = _reference(x, gamma, beta, w1, b1, w2, b2,
                     use_bf16=True, gelu_approximate=True)
    assert out.shape == (B, S, C)
    assert jnp.allclose(out, ref, atol=1e-3, rtol=1e-3), "mismatch vs reference"

    print("KERNEL_OK")
</pallas_src>

<mosaic_0001>
module attributes {stable_mosaic.version = 11 : i64} {
  func.func @_channel_mixing_kernel(%arg0: i32, %arg1: i32, %arg2: memref<16x32xf32, #tpu.memory_space<vmem>>, %arg3: memref<1x32xf32, #tpu.memory_space<vmem>>, %arg4: memref<1x32xf32, #tpu.memory_space<vmem>>, %arg5: memref<32x64xbf16, #tpu.memory_space<vmem>>, %arg6: memref<1x64xf32, #tpu.memory_space<vmem>>, %arg7: memref<64x32xbf16, #tpu.memory_space<vmem>>, %arg8: memref<1x32xf32, #tpu.memory_space<vmem>>, %arg9: memref<16x32xf32, #tpu.memory_space<vmem>>, %arg10: memref<16x32xbf16, #tpu.memory_space<vmem>>, %arg11: memref<16x32xf32, #tpu.memory_space<vmem>>) attributes {dimension_semantics = [#tpu.dimension_semantics<parallel>, #tpu.dimension_semantics<arbitrary>], iteration_bounds = array<i64: 1, 1>, scalar_prefetch = 0 : i64, scratch_operands = 2 : i64, tpu.core_type = #tpu.core_type<tc>, window_params = [{transform_indices = @transform_0, window_bounds = array<i64: 16, 32>}, {pipeline_mode = #tpu.pipeline_mode<synchronous>, transform_indices = @transform_1, window_bounds = array<i64: 1, 32>}, {pipeline_mode = #tpu.pipeline_mode<synchronous>, transform_indices = @transform_2, window_bounds = array<i64: 1, 32>}, {pipeline_mode = #tpu.pipeline_mode<synchronous>, transform_indices = @transform_3, window_bounds = array<i64: 32, 64>}, {pipeline_mode = #tpu.pipeline_mode<synchronous>, transform_indices = @transform_4, window_bounds = array<i64: 1, 64>}, {pipeline_mode = #tpu.pipeline_mode<synchronous>, transform_indices = @transform_5, window_bounds = array<i64: 64, 32>}, {pipeline_mode = #tpu.pipeline_mode<synchronous>, transform_indices = @transform_6, window_bounds = array<i64: 1, 32>}, {transform_indices = @transform_7, window_bounds = array<i64: 16, 32>}]} {
    %c0_i32 = arith.constant 0 : i32
    %0 = arith.cmpi eq, %arg1, %c0_i32 : i32
    %1 = arith.extui %0 : i1 to i32
    %c0_i32_0 = arith.constant 0 : i32
    %2 = arith.cmpi ne, %1, %c0_i32_0 : i32
    scf.if %2 {
      %c0_19 = arith.constant 0 : index
      %c0_20 = arith.constant 0 : index
      %31 = vector.load %arg2[%c0_19, %c0_20] : memref<16x32xf32, #tpu.memory_space<vmem>>, vector<16x32xf32>
      %cst_21 = arith.constant dense<0.000000e+00> : vector<16xf32>
      %32 = vector.multi_reduction <add>, %31, %cst_21 [1] : vector<16x32xf32> to vector<16xf32>
      %33 = vector.shape_cast %32 : vector<16xf32> to vector<16x1xf32>
      %cst_22 = arith.constant 3.125000e-02 : f32
      %34 = vector.broadcast %cst_22 : f32 to vector<16x1xf32>
      %35 = arith.mulf %33, %34 : vector<16x1xf32>
      %36 = vector.broadcast %35 : vector<16x1xf32> to vector<16x32xf32>
      %37 = arith.subf %31, %36 : vector<16x32xf32>
      %38 = arith.mulf %37, %37 : vector<16x32xf32>
      %cst_23 = arith.constant dense<0.000000e+00> : vector<16xf32>
      %39 = vector.multi_reduction <add>, %38, %cst_23 [1] : vector<16x32xf32> to vector<16xf32>
      %40 = vector.shape_cast %39 : vector<16xf32> to vector<16x1xf32>
      %cst_24 = arith.constant 3.125000e-02 : f32
      %41 = vector.broadcast %cst_24 : f32 to vector<16x1xf32>
      %42 = arith.mulf %40, %41 : vector<16x1xf32>
      %cst_25 = arith.constant 9.99999974E-6 : f32
      %43 = vector.broadcast %cst_25 : f32 to vector<16x1xf32>
      %44 = arith.addf %42, %43 : vector<16x1xf32>
      %45 = math.rsqrt %44 : vector<16x1xf32>
      %46 = vector.broadcast %45 : vector<16x1xf32> to vector<16x32xf32>
      %47 = arith.mulf %37, %46 : vector<16x32xf32>
      %c0_26 = arith.constant 0 : index
      %c0_27 = arith.constant 0 : index
      %48 = vector.load %arg3[%c0_26, %c0_27] : memref<1x32xf32, #tpu.memory_space<vmem>>, vector<1x32xf32>
      %49 = vector.broadcast %48 : vector<1x32xf32> to vector<16x32xf32>
      %50 = arith.mulf %47, %49 : vector<16x32xf32>
      %c0_28 = arith.constant 0 : index
      %c0_29 = arith.constant 0 : index
      %51 = vector.load %arg4[%c0_28, %c0_29] : memref<1x32xf32, #tpu.memory_space<vmem>>, vector<1x32xf32>
      %52 = vector.broadcast %51 : vector<1x32xf32> to vector<16x32xf32>
      %53 = arith.addf %50, %52 : vector<16x32xf32>
      %54 = arith.truncf %53 : vector<16x32xf32> to vector<16x32xbf16>
      %c0_30 = arith.constant 0 : index
      %c0_31 = arith.constant 0 : index
      %55 = vector.load %arg10[%c0_30, %c0_31] : memref<16x32xbf16, #tpu.memory_space<vmem>>, vector<16x32xbf16>
      tpu.vector_store %arg10[%c0_30, %c0_31], %54 {strides = array<i32>} : memref<16x32xbf16, #tpu.memory_space<vmem>>, vector<16x32xbf16>,
      %cst_32 = arith.constant 0.000000e+00 : f32
      %56 = vector.broadcast %cst_32 : f32 to vector<16x32xf32>
      %c0_33 = arith.constant 0 : index
      %c0_34 = arith.constant 0 : index
      %57 = vector.load %arg11[%c0_33, %c0_34] : memref<16x32xf32, #tpu.memory_space<vmem>>, vector<16x32xf32>
      tpu.vector_store %arg11[%c0_33, %c0_34], %56 {strides = array<i32>} : memref<16x32xf32, #tpu.memory_space<vmem>>, vector<16x32xf32>,
    } else {
    }
    %c0 = arith.constant 0 : index
    %c0_1 = arith.constant 0 : index
    %3 = vector.load %arg10[%c0, %c0_1] : memref<16x32xbf16, #tpu.memory_space<vmem>>, vector<16x32xbf16>
    %c0_2 = arith.constant 0 : index
    %c0_3 = arith.constant 0 : index
    %4 = vector.load %arg5[%c0_2, %c0_3] : memref<32x64xbf16, #tpu.memory_space<vmem>>, vector<32x64xbf16>
    %cst = arith.constant dense<0.000000e+00> : vector<16x64xf32>
    %5 = tpu.matmul %3, %4, %cst {dimension_numbers = #tpu.dot_dimension_numbers<[1], [0], [0], [1], [0, 0, 1, 1], [], []>} : vector<16x32xbf16>, vector<32x64xbf16>, vector<16x64xf32> -> vector<16x64xf32>
    %c0_4 = arith.constant 0 : index
    %c0_5 = arith.constant 0 : index
    %6 = vector.load %arg6[%c0_4, %c0_5] : memref<1x64xf32, #tpu.memory_space<vmem>>, vector<1x64xf32>
    %7 = vector.broadcast %6 : vector<1x64xf32> to vector<16x64xf32>
    %8 = arith.addf %5, %7 : vector<16x64xf32>
    %9 = arith.mulf %8, %8 : vector<16x64xf32>
    %10 = arith.mulf %8, %9 : vector<16x64xf32>
    %cst_6 = arith.constant 4.471500e-02 : f32
    %11 = vector.broadcast %cst_6 : f32 to vector<16x64xf32>
    %12 = arith.mulf %11, %10 : vector<16x64xf32>
    %13 = arith.addf %8, %12 : vector<16x64xf32>
    %cst_7 = arith.constant 0.797884583 : f32
    %14 = vector.broadcast %cst_7 : f32 to vector<16x64xf32>
    %15 = arith.mulf %14, %13 : vector<16x64xf32>
    %16 = math.tanh %15 : vector<16x64xf32>
    %cst_8 = arith.constant 1.000000e+00 : f32
    %17 = vector.broadcast %cst_8 : f32 to vector<16x64xf32>
    %18 = arith.addf %17, %16 : vector<16x64xf32>
    %cst_9 = arith.constant 5.000000e-01 : f32
    %19 = vector.broadcast %cst_9 : f32 to vector<16x64xf32>
    %20 = arith.mulf %19, %18 : vector<16x64xf32>
    %21 = arith.mulf %8, %20 : vector<16x64xf32>
    %c0_10 = arith.constant 0 : index
    %c0_11 = arith.constant 0 : index
    %22 = vector.load %arg11[%c0_10, %c0_11] : memref<16x32xf32, #tpu.memory_space<vmem>>, vector<16x32xf32>
    %23 = arith.truncf %21 : vector<16x64xf32> to vector<16x64xbf16>
    %c0_12 = arith.constant 0 : index
    %c0_13 = arith.constant 0 : index
    %24 = vector.load %arg7[%c0_12, %c0_13] : memref<64x32xbf16, #tpu.memory_space<vmem>>, vector<64x32xbf16>
    %cst_14 = arith.constant dense<0.000000e+00> : vector<16x32xf32>
    %25 = tpu.matmul %23, %24, %cst_14 {dimension_numbers = #tpu.dot_dimension_numbers<[1], [0], [0], [1], [0, 0, 1, 1], [], []>} : vector<16x64xbf16>, vector<64x32xbf16>, vector<16x32xf32> -> vector<16x32xf32>
    %26 = arith.addf %22, %25 : vector<16x32xf32>
    %c0_15 = arith.constant 0 : index
    %c0_16 = arith.constant 0 : index
    %27 = vector.load %arg11[%c0_15, %c0_16] : memref<16x32xf32, #tpu.memory_space<vmem>>, vector<16x32xf32>
    tpu.vector_store %arg11[%c0_15, %c0_16], %26 {strides = array<i32>} : memref<16x32xf32, #tpu.memory_space<vmem>>, vector<16x32xf32>,
    %c0_i32_17 = arith.constant 0 : i32
    %28 = arith.cmpi eq, %arg1, %c0_i32_17 : i32
    %29 = arith.extui %28 : i1 to i32
    %c0_i32_18 = arith.constant 0 : i32
    %30 = arith.cmpi ne, %29, %c0_i32_18 : i32
    scf.if %30 {
      %c0_19 = arith.constant 0 : index
      %c0_20 = arith.constant 0 : index
      %31 = vector.load %arg11[%c0_19, %c0_20] : memref<16x32xf32, #tpu.memory_space<vmem>>, vector<16x32xf32>
      %c0_21 = arith.constant 0 : index
      %c0_22 = arith.constant 0 : index
      %32 = vector.load %arg8[%c0_21, %c0_22] : memref<1x32xf32, #tpu.memory_space<vmem>>, vector<1x32xf32>
      %33 = vector.broadcast %32 : vector<1x32xf32> to vector<16x32xf32>
      %34 = arith.addf %31, %33 : vector<16x32xf32>
      %c0_23 = arith.constant 0 : index
      %c0_24 = arith.constant 0 : index
      %35 = vector.load %arg2[%c0_23, %c0_24] : memref<16x32xf32, #tpu.memory_space<vmem>>, vector<16x32xf32>
      %36 = arith.addf %34, %35 : vector<16x32xf32>
      %c0_25 = arith.constant 0 : index
      %c0_26 = arith.constant 0 : index
      %37 = vector.load %arg9[%c0_25, %c0_26] : memref<16x32xf32, #tpu.memory_space<vmem>>, vector<16x32xf32>
      tpu.vector_store %arg9[%c0_25, %c0_26], %36 {strides = array<i32>} : memref<16x32xf32, #tpu.memory_space<vmem>>, vector<16x32xf32>,
    } else {
    }
    return
  }
  func.func @transform_0(%arg0: i32, %arg1: i32) -> (i32, i32) {
    %c0_i32 = arith.constant 0 : i32
    %c0_i32_0 = arith.constant 0 : i32
    return %arg0, %c0_i32 : i32, i32
  }
  func.func @transform_1(%arg0: i32, %arg1: i32) -> (i32, i32) {
    %c0_i32 = arith.constant 0 : i32
    %c0_i32_0 = arith.constant 0 : i32
    %c0_i32_1 = arith.constant 0 : i32
    return %c0_i32, %c0_i32_0 : i32, i32
  }
  func.func @transform_2(%arg0: i32, %arg1: i32) -> (i32, i32) {
    %c0_i32 = arith.constant 0 : i32
    %c0_i32_0 = arith.constant 0 : i32
    %c0_i32_1 = arith.constant 0 : i32
    return %c0_i32, %c0_i32_0 : i32, i32
  }
  func.func @transform_3(%arg0: i32, %arg1: i32) -> (i32, i32) {
    %c0_i32 = arith.constant 0 : i32
    %c0_i32_0 = arith.constant 0 : i32
    return %c0_i32, %arg1 : i32, i32
  }
  func.func @transform_4(%arg0: i32, %arg1: i32) -> (i32, i32) {
    %c0_i32 = arith.constant 0 : i32
    %c0_i32_0 = arith.constant 0 : i32
    return %c0_i32, %arg1 : i32, i32
  }
  func.func @transform_5(%arg0: i32, %arg1: i32) -> (i32, i32) {
    %c0_i32 = arith.constant 0 : i32
    %c0_i32_0 = arith.constant 0 : i32
    return %arg1, %c0_i32 : i32, i32
  }
  func.func @transform_6(%arg0: i32, %arg1: i32) -> (i32, i32) {
    %c0_i32 = arith.constant 0 : i32
    %c0_i32_0 = arith.constant 0 : i32
    %c0_i32_1 = arith.constant 0 : i32
    return %c0_i32, %c0_i32_0 : i32, i32
  }
  func.func @transform_7(%arg0: i32, %arg1: i32) -> (i32, i32) {
    %c0_i32 = arith.constant 0 : i32
    %c0_i32_0 = arith.constant 0 : i32
    return %arg0, %c0_i32 : i32, i32
  }
}

</mosaic_0001>

<bundles_post_ra>
// kernel: channel_mixing_mlp.1
= control target key start
LH: loop header
LB: loop body
LE: loop exit
PB: predicated region body
PF: predicated region fallthrough
CT: control target
= control target key end

     0   :  { %vm34_vm0 = vcmask 261120   ;;  %s488_s0 = inlined_call_operand.vmem [shape: f32[16,32], index: 0, kind: input, shape index: {}]   ;;  %s489_s1 = inlined_call_operand.vmem [shape: f32[1,32], index: 1, kind: input, shape index: {}]   ;;  %s490_s2 = inlined_call_operand.vmem [shape: f32[1,32], index: 2, kind: input, shape index: {}]   ;;  %s491_s3 = inlined_call_operand.vmem [shape: bf16[32,64], index: 3, kind: input, shape index: {}]   ;;  %s492_s4 = inlined_call_operand.vmem [shape: f32[1,64], index: 4, kind: input, shape index: {}]   ;;  %s493_s5 = inlined_call_operand.vmem [shape: bf16[64,32], index: 5, kind: input, shape index: {}]   ;;  %s494_s6 = inlined_call_operand.vmem [shape: f32[1,32], index: 6, kind: input, shape index: {}]   ;;  %s495_s7 = inlined_call_operand.hbm [shape: f32[16,32], index: 7, kind: output, shape index: {}]  }
   0x1   :  { %v421_v0 = vld [vmem:[%s488_s0] sm:$0xff]  ;;  %v426_v1 = vld [vmem:[%s488_s0 + $0x8] sm:$0xff] }
   0x2   :  { %v35_v2 = vsel %vm34_vm0, %v421_v0, 0.0  ;;  %v38_v3 = vsel %vm34_vm0, %v426_v1, 0.0 }
   0x3   :  { %36 = vadd.xlane.f32.xlu0 %v35_v2 }
   0x4   :  { %12 = vsyncpa [#allocation5], 0  ;;  %v335_v14 = vld [vmem:[%s491_s3] sm:$0xff]   ;;  %v373_v15 = vmov 0.0   ;;  %v336_v16 = vld [vmem:[%s491_s3 + $0x8] sm:$0xff]   ;;  %vm374_vm1 = vmmov 0  }
   0x5   :  { %310 = vmatprep.subr.bf16.mxu0 %v373_v15  ;;  %81 = vst.msk [vmem:[#allocation3] sm:$0xff] %vm34_vm0, %v373_v15  ;;  %82 = vst.msk [vmem:[#allocation3 + $0x8] sm:$0xff] %vm34_vm0, %v373_v15  ;;  %318 = vmatprep.subr.bf16.mxu1 %v373_v15  ;;  %v290_v25 = vld [vmem:[%s489_s1] ss:$0 sm:$0xff]  ;;  %v338_v36 = vld [vmem:[%s493_s5 + $0x8] sm:$0xff]   ;;  %vm205_vm2 = vcmask 523264  }
   0x6   :  { %311 = vmatpush3.bf16.msra.mxu0 %v335_v14  ;;  %314 = vmatprep.mubr.msk.bf16.mxu0 %vm374_vm1, %v373_v15  ;;  %v291_v29 = vld [vmem:[%s490_s2] ss:$0 sm:$0xff]  ;;  %v339_v37 = vld [vmem:[%s493_s5 + $0x10] sm:$0xff]   ;;  %v340_v38 = vld [vmem:[%s493_s5 + $0x18] sm:$0xff]   ;;  %s375_s19 = smov [#allocation4]  }
   0x7   :  { %39 = vadd.xlane.f32.xlu0 %v38_v3  ;;  %312 = vmatprep.subr.bf16.mxu0 %v373_v15  ;;  %v337_v35 = vld [vmem:[%s493_s5] sm:$0xff]   ;;  %s279_s20 = sshll.u32 %s375_s19, 4  ;;  %s280_s20 = int_to_ptr.vmem [resolvable:$true] %s279_s20 }
   0x8   :  { %326 = vmatprep.mubr.msk.bf16.mxu1 %vm374_vm1, %v373_v15  ;;  %319 = vmatpush3.bf16.msra.mxu1 %v337_v35  ;;  %v292_v39 = vld [vmem:[%s492_s4] ss:$0 sm:$0xff]  ;;  %s349_s21 = scalar_lea.vmem %s280_s20, 256  ;;  %p354_p1 = scmp.lt.s32.totalorder %s280_s20, %s280_s20 }
   0x9   :  { %320 = vmatprep.subr.bf16.mxu1 %v373_v15  ;;  %p350_p0 = scmp.ne.s32.totalorder %s280_s20, %s349_s21  ;;  %p355_p2 = scmp.lt.s32.totalorder %s349_s21, %s349_s21 }
   0xa   :  { %313 = vmatpush3.bf16.msra.mxu0 %v336_v16 }
   0xb   :  { %p356_p3 = por %p355_p2, %p354_p1 }
   0xc   :  { %321 = vmatpush3.bf16.msra.mxu1 %v338_v36  ;;  %v170_v3 = vld [vmem:[#allocation3] sm:$0xff] }
   0xd   :  { %322 = vmatprep.subr.bf16.mxu1 %v373_v15  ;;  %p357_p4 = pnand %p356_p3, %p350_p0 }
  0x10   :  { %323 = vmatpush3.bf16.msra.mxu1 %v339_v37 }
  0x11   :  { %324 = vmatprep.subr.bf16.mxu1 %v373_v15 }
  0x14   :  { %325 = vmatpush3.bf16.msra.mxu1 %v340_v38 }
  0x90   :  { %v37_v4 = vpop.xlane.xlu0 %36 }
  0x91   :  { %v41_v5 = vmul.f32 0.03125, %v37_v4 }
  0x93   :  { %v43_v6 = vsub.f32 %v421_v0, %v41_v5  ;;  %v171_v5 = vld [vmem:[#allocation3 + $0x8] sm:$0xff] }
  0x94   :  { %v40_v7 = vpop.xlane.xlu0 %39 }
  0x95   :  { %v42_v8 = vmul.f32 0.03125, %v40_v7  ;;  %v45_v9 = vmul.f32 %v43_v6, %v43_v6 }
  0x97   :  { %v44_v10 = vsub.f32 %v426_v1, %v42_v8  ;;  %v47_v11 = vsel %vm34_vm0, %v45_v9, 0.0 }
  0x98   :  { %48 = vadd.xlane.f32.xlu1 %v47_v11  ;;  %v301_v11 = vld [vmem:[%s494_s6] ss:$0 sm:$0xff] }
  0x99   :  { %v46_v12 = vmul.f32 %v44_v10, %v44_v10 }
  0x9b   :  { %v50_v13 = vsel %vm34_vm0, %v46_v12, 0.0 }
  0x9c   :  { %51 = vadd.xlane.f32.xlu1 %v50_v13 }
 0x125   :  { %v49_v17 = vpop.xlane.xlu1 %48 }
 0x126   :  { %v53_v18 = vmul.f32 0.03125, %v49_v17 }
 0x128   :  { %v55_v19 = vadd.f32 1e-05, %v53_v18 }
 0x129   :  { %v52_v20 = vpop.xlane.xlu1 %51 }
 0x12a   :  { %341 = vrsqrt.f32 %v55_v19  ;;  %v54_v21 = vmul.f32 0.03125, %v52_v20 }
 0x12c   :  { %v56_v22 = vadd.f32 1e-05, %v54_v21 }
 0x12e   :  { %343 = vrsqrt.f32 %v56_v22 }
 0x134   :  { %v342_v23 = vpop.eup %341 }
 0x135   :  { %v59_v24 = vmul.f32 %v342_v23, %v43_v6 }
 0x137   :  { %v68_v27 = vmul.f32 %v290_v25, %v59_v24 }
 0x138   :  { %v344_v26 = vpop.eup %343 }
 0x139   :  { %v60_v28 = vmul.f32 %v344_v26, %v44_v10  ;;  %v77_v31 = vadd.f32 %v291_v29, %v68_v27 }
 0x13b   :  { %v69_v30 = vmul.f32 %v290_v25, %v60_v28 }
 0x13d   :  { %v78_v32 = vadd.f32 %v291_v29, %v69_v30 }
 0x13f   :  { %v79_v33 = vpack.c.bf16 %v78_v32, %v77_v31 }
 0x141   :  { %80 = vst.msk [vmem:[#allocation2] sm:$0xff] %vm34_vm0, %v79_v33 }
 0x148   :  { %v83_v34 = vld [vmem:[#allocation2] sm:$0xff] }
 0x149   :  { %315 = vmatmul.mubr.msk.bf16.vlgmr.msra.gmra.mrb[0].mxu0 %vm34_vm0, %v83_v34 }
 0x21c   :  { %v145_v40 = vpop.f32.mrb[0].mxu0 }
 0x21d   :  { %v146_v41 = vadd.f32 %v292_v39, %v145_v40  ;;  %v316_v42 = vpop.f32.mrb[1].mxu0 }
 0x21e   :  { %v148_v43 = vpop.f32.mrb[2].mxu0 }
 0x21f   :  { %v152_v44 = vmul.f32 %v146_v41, %v146_v41  ;;  %v149_v45 = vadd.f32 %v292_v39, %v148_v43  ;;  %v317_v46 = vpop.f32.mrb[3].mxu0 }
 0x221   :  { %v154_v47 = vmul.f32 %v152_v44, %v146_v41  ;;  %v153_v48 = vmul.f32 %v149_v45, %v149_v45 }
 0x223   :  { %v156_v49 = vmul.f32 0.044715, %v154_v47  ;;  %v155_v50 = vmul.f32 %v153_v48, %v149_v45 }
 0x225   :  { %v158_v51 = vadd.f32 %v156_v49, %v146_v41  ;;  %v157_v52 = vmul.f32 0.044715, %v155_v50 }
 0x227   :  { %v160_v53 = vmul.f32 0.7978846, %v158_v51  ;;  %v159_v54 = vadd.f32 %v157_v52, %v149_v45 }
 0x229   :  { %345 = vtanh.f32 %v160_v53  ;;  %v161_v55 = vmul.f32 0.7978846, %v159_v54 }
 0x22b   :  { %347 = vtanh.f32 %v161_v55 }
 0x233   :  { %v346_v56 = vpop.eup %345 }
 0x234   :  { %v164_v57 = vadd.f32 1.0, %v346_v56 }
 0x235   :  { %v348_v58 = vpop.eup %347 }
 0x236   :  { %v166_v59 = vmul.f32 0.5, %v164_v57  ;;  %v165_v60 = vadd.f32 1.0, %v348_v58 }
 0x238   :  { %v167_v61 = vmul.f32 0.5, %v165_v60  ;;  %v168_v62 = vmul.f32 %v166_v59, %v146_v41 }
 0x23a   :  { %v169_v63 = vmul.f32 %v167_v61, %v149_v45 }
 0x23c   :  { %v172_v2 = vpack.c.bf16 %v169_v63, %v168_v62 }
 0x23e   :  { %327 = vmatmul.mubr.msk.bf16.vlgmr.msra.gmra.mrb[0].mxu1 %vm205_vm2, %v172_v2 }
 0x311   :  { %v243_v4 = vpop.f32.mrb[0].mxu1 }
 0x312   :  { %v250_v6 = vadd.f32 %v243_v4, %v170_v3  ;;  %v328_v7 = vpop.f32.mrb[1].mxu1 }
 0x313   :  { %v246_v8 = vpop.f32.mrb[2].mxu1 }
 0x314   :  { %252 = vst.msk [vmem:[#allocation3] sm:$0xff] %vm34_vm0, %v250_v6  ;;  %v251_v9 = vadd.f32 %v246_v8, %v171_v5  ;;  %v329_v10 = vpop.f32.mrb[3].mxu1 }
 0x316   :  { %253 = vst.msk [vmem:[#allocation3 + $0x8] sm:$0xff] %vm34_vm0, %v251_v9 }
 0x31b   :  { %v257_v12 = vld [vmem:[#allocation3] sm:$0xff] }
 0x31c   :  { %v266_v13 = vadd.f32 %v301_v11, %v257_v12 }
 0x31d   :  { %v258_v14 = vld [vmem:[#allocation3 + $0x8] sm:$0xff] }
 0x31e   :  { %v267_v15 = vadd.f32 %v301_v11, %v258_v14  ;;  %v270_v16 = vadd.f32 %v266_v13, %v421_v0 }
 0x320   :  { %v271_v17 = vadd.f32 %v267_v15, %v426_v1  ;;  %272 = vst.msk [vmem:[#allocation4] sm:$0xff] %vm34_vm0, %v270_v16 }
 0x322   :  { %273 = vst.msk [vmem:[#allocation4 + $0x8] sm:$0xff] %vm34_vm0, %v271_v17 }
 0x323   :  { %360 = shalt.err (!%p357_p4)
}
 0x324   :  { %s361_s23 = scalar_lea.hbm %s495_s7, 256 }
 0x325   :  { %p362_p5 = scmp.ne.s32.totalorder %s495_s7, %s361_s23  ;;  %p365_p6 = scmp.lt.u32.totalorder %s361_s23, %s495_s7 }
 0x327   :  { %p367_p7 = pnand %p365_p6, %p362_p5 }
 0x329   :  { %370 = shalt.err (!%p367_p7)
}
 0x32a   :  { %s376_s0 = smov 128   ;;  %s377_s28 = smov 8  }
 0x32b   :  { %285 = dma.vmem_to_hbm [thread:$0]  %s280_s20, 256, %s495_s7, [#allocation5], %s376_s0, %s376_s0, %s377_s28  }
 0x32c   :  { %371 = dma.done.wait [#allocation5], 256  }
 0x32d   :  { %372 = vsyncadd [#allocation5], 4294967040 }
 0x32e   :  { %289 = vsyncpa [#allocation5], 1 }

</bundles_post_ra>
